<compile_context>
chip_gen: v7x
topology: tpu7x:2x2x1
jax: 0.10.0
libtpu: 0.0.40
codegen_flags: <defaults>
</compile_context>

<pallas_src>
import functools

import jax
import jax.numpy as jnp
import numpy as np
from jax.experimental import pallas as pl
from jax.experimental.pallas import tpu as pltpu

KERNEL_SIZE = 5
PADDING = 2
EPS = 1e-12  # F.normalize default eps


def _make_gather_mats(w, k, pad):
    """Constant 0/1 matrices implementing the (j, u, v) -> j*k*k + u*k + v
    interleave as matmuls.

    G[j', m]      = 1  iff  j' == j(m)                      (identity factor)
    H[u, j', m]   = 1  iff  u == u(m) and j' == j(m)+v(m)-pad, in [0, w)
                                                             (unfold factor;
                                                              column padding
                                                              folded in as 0s)
    """
    wkk = w * k * k
    G = np.zeros((w, wkk), np.float32)
    H = np.zeros((k, w, wkk), np.float32)
    for j in range(w):
        for u in range(k):
            for v in range(k):
                m = (j * k + u) * k + v
                G[j, m] = 1.0
                jj = j + v - pad
                if 0 <= jj < w:
                    H[u, jj, m] = 1.0
    return jnp.asarray(G), jnp.asarray(H)


def _scr_kernel(x_ref, g_ref, h_ref, o_ref, xn_scr, *, c, h, w, k, pad, th):
    # x_ref : (1, c, h, w)            input (constant across row-tiles)
    # g_ref : (w, w*k*k)              identity-factor gather matrix
    # h_ref : (k, w, w*k*k)           unfold-factor gather matrices (per u)
    # o_ref : (1, c, th, w*k*k)       output row-tile, lane-dense last dim
    # xn_scr: (c, h + 2*pad, w)       row-padded normalized map (per batch)
    ti = pl.program_id(1)
    wkk = w * k * k

    # ---- once per batch: ReLU + p=3 channel normalization, cached in VMEM
    @pl.when(ti == 0)
    def _():
        x = x_ref[0].astype(jnp.float32)                   # (c, h, w)
        xr = jnp.maximum(x, 0.0)
        s = jnp.sum(xr * xr * xr, axis=0)                  # (h, w); |x|^3 == x^3 after ReLU
        # cube root via exp(log(s)/3); log(0) = -inf -> exp(-inf) = 0, no NaNs
        cbrt = jnp.exp(jnp.log(s) * (1.0 / 3.0))
        inv = 1.0 / jnp.maximum(cbrt, jnp.float32(EPS))    # one reciprocal per pixel
        xn = xr * inv[None, :, :]                          # (c, h, w)
        zrow = jnp.zeros((c, pad, w), jnp.float32)
        xn_scr[:, :pad, :] = zrow                          # zero top border rows
        xn_scr[:, pad + h:, :] = zrow                      # zero bottom border rows
        xn_scr[:, pad:pad + h, :] = xn                     # interior

    # ---- per (batch, row-tile): build interleaved (c, th, w*k*k) slab
    r0 = ti * th
    if th % 8 == 0:
        r0 = pl.multiple_of(r0, 8)

    # identity factor: E[row, m] = xn[c, i, j(m)]
    ident = xn_scr[:, pl.ds(pad + r0, th), :]              # (c, th, w)
    e2 = jnp.dot(ident.reshape(c * th, w), g_ref[...],
                 preferred_element_type=jnp.float32)       # (c*th, wkk)

    # unfold factor: F[row, m] = xp[c, i+u(m), j(m)+v(m)]
    # row shift u comes from slicing the row-padded scratch (hoisted out of the
    # v loop); column shift/padding is folded into H[u].
    lhs0 = xn_scr[:, pl.ds(r0, th), :].reshape(c * th, w)
    f2 = jnp.dot(lhs0, h_ref[0], preferred_element_type=jnp.float32)
    for u in range(1, k):
        lhs = xn_scr[:, pl.ds(r0 + u, th), :].reshape(c * th, w)
        f2 = f2 + jnp.dot(lhs, h_ref[u], preferred_element_type=jnp.float32)

    o_ref[0] = (e2 * f2).reshape(c, th, wkk).astype(o_ref.dtype)


def self_correlation_computation(x, kernel_size=KERNEL_SIZE, padding=PADDING):
    b, c, h, w = x.shape
    k = kernel_size
    pad = padding
    # The module's .view(b, c, k, k, h, w) implicitly requires L == h*w,
    # i.e. 2*padding == kernel_size - 1.
    assert 2 * pad == k - 1, "unfold output must keep spatial size"
    wkk = w * k * k

    # Row tile for the output: keep the (1, c, th, w*k*k) block within a VMEM
    # budget (important at production shapes / on v7x's 64 MiB VMEM) while
    # keeping th a multiple of 8 sublanes.
    budget = 4 * 1024 * 1024
    th = h
    if c * h * wkk * 4 > budget and h % 8 == 0:
        cands = [d for d in range(8, h, 8)
                 if h % d == 0 and c * d * wkk * 4 <= budget]
        th = max(cands) if cands else 8
    nt = h // th

    G, H = _make_gather_mats(w, k, pad)

    kern = functools.partial(_scr_kernel, c=c, h=h, w=w, k=k, pad=pad, th=th)

    # Explicit scoped-VMEM limit (v5e default is only 16 MiB), with headroom.
    x_bytes = c * h * w * 4
    o_bytes = c * th * wkk * 4
    const_bytes = (w * wkk + k * w * wkk) * 4
    scr_bytes = c * (h + 2 * pad) * w * 4
    need = 2 * (x_bytes + o_bytes) + 2 * const_bytes + scr_bytes + (8 << 20)
    vmem_limit = int(min(max(need, 32 << 20), 48 << 20))

    out4 = pl.pallas_call(
        kern,
        out_shape=jax.ShapeDtypeStruct((b, c, h, wkk), x.dtype),
        grid=(b, nt),
        in_specs=[
            pl.BlockSpec((1, c, h, w), lambda bi, ti: (bi, 0, 0, 0)),
            pl.BlockSpec((w, wkk), lambda bi, ti: (0, 0)),
            pl.BlockSpec((k, w, wkk), lambda bi, ti: (0, 0, 0)),
        ],
        out_specs=pl.BlockSpec((1, c, th, wkk),
                               lambda bi, ti: (bi, 0, ti, 0)),
        scratch_shapes=[pltpu.VMEM((c, h + 2 * pad, w), jnp.float32)],
        compiler_params=pltpu.CompilerParams(
            dimension_semantics=("parallel", "arbitrary"),
            vmem_limit_bytes=vmem_limit),
    )(x, G, H)

    # (b, c, h, w*k*k) and (b, c, h, w, k, k) share the same memory layout:
    # this reshape is free (no HBM round-trip, unlike the old transpose).
    return out4.reshape(b, c, h, w, k, k)


def _reference(x, k=KERNEL_SIZE, pad=PADDING):
    """Pure-JAX reference reproducing the PyTorch forward."""
    b, c, h, w = x.shape
    xr = jnp.maximum(x, 0.0)
    s = jnp.sum(xr ** 3, axis=1, keepdims=True)
    denom = jnp.maximum(jnp.cbrt(s), EPS)
    xn = xr / denom
    xp = jnp.pad(xn, ((0, 0), (0, 0), (pad, pad), (pad, pad)))
    cols = []
    for u in range(k):
        rows = []
        for v in range(k):
            rows.append(xn * xp[:, :, u:u + h, v:v + w])
        cols.append(jnp.stack(rows, axis=-1))       # stack over v -> last axis
    return jnp.stack(cols, axis=-2)                 # stack over u -> (b,c,h,w,k,k)


if __name__ == "__main__":
    key = jax.random.PRNGKey(0)
    x = jax.random.normal(key, (2, 4, 16, 16), dtype=jnp.float32)

    out = self_correlation_computation(x)
    out = jax.block_until_ready(out)

    ref = _reference(x)
    assert out.shape == (2, 4, 16, 16, KERNEL_SIZE, KERNEL_SIZE)
    assert out.dtype == ref.dtype
    np.testing.assert_allclose(np.asarray(out), np.asarray(ref),
                               rtol=2e-5, atol=2e-5)
    print("KERNEL_OK")
</pallas_src>

<mosaic_0001>
module attributes {stable_mosaic.version = 11 : i64} {
  func.func @_scr_kernel(%arg0: i32, %arg1: i32, %arg2: memref<1x4x16x16xf32, #tpu.memory_space<vmem>>, %arg3: memref<16x400xf32, #tpu.memory_space<vmem>>, %arg4: memref<5x16x400xf32, #tpu.memory_space<vmem>>, %arg5: memref<1x4x16x400xf32, #tpu.memory_space<vmem>>, %arg6: memref<4x20x16xf32, #tpu.memory_space<vmem>>) attributes {dimension_semantics = [#tpu.dimension_semantics<parallel>, #tpu.dimension_semantics<arbitrary>], iteration_bounds = array<i64: 2, 1>, scalar_prefetch = 0 : i64, scratch_operands = 1 : i64, tpu.core_type = #tpu.core_type<tc>, window_params = [{transform_indices = @transform_0, window_bounds = array<i64: 1, 4, 16, 16>}, {pipeline_mode = #tpu.pipeline_mode<synchronous>, transform_indices = @transform_1, window_bounds = array<i64: 16, 400>}, {pipeline_mode = #tpu.pipeline_mode<synchronous>, transform_indices = @transform_2, window_bounds = array<i64: 5, 16, 400>}, {transform_indices = @transform_3, window_bounds = array<i64: 1, 4, 16, 400>}]} {
    %c0_i32 = arith.constant 0 : i32
    %0 = arith.cmpi eq, %arg1, %c0_i32 : i32
    %1 = arith.extui %0 : i1 to i32
    %c0_i32_0 = arith.constant 0 : i32
    %2 = arith.cmpi ne, %1, %c0_i32_0 : i32
    scf.if %2 {
      %c0_35 = arith.constant 0 : index
      %c0_36 = arith.constant 0 : index
      %c0_37 = arith.constant 0 : index
      %c0_38 = arith.constant 0 : index
      %54 = vector.load %arg2[%c0_35, %c0_36, %c0_37, %c0_38] : memref<1x4x16x16xf32, #tpu.memory_space<vmem>>, vector<1x4x16x16xf32>
      %55 = vector.shape_cast %54 : vector<1x4x16x16xf32> to vector<4x16x16xf32>
      %cst_39 = arith.constant 0.000000e+00 : f32
      %56 = vector.broadcast %cst_39 : f32 to vector<4x16x16xf32>
      %57 = arith.maximumf %55, %56 : vector<4x16x16xf32>
      %58 = arith.mulf %57, %57 : vector<4x16x16xf32>
      %59 = arith.mulf %58, %57 : vector<4x16x16xf32>
      %cst_40 = arith.constant dense<0.000000e+00> : vector<16x16xf32>
      %60 = vector.multi_reduction <add>, %59, %cst_40 [0] : vector<4x16x16xf32> to vector<16x16xf32>
      %61 = math.log %60 : vector<16x16xf32>
      %cst_41 = arith.constant 0.333333343 : f32
      %62 = vector.broadcast %cst_41 : f32 to vector<16x16xf32>
      %63 = arith.mulf %61, %62 : vector<16x16xf32>
      %64 = math.exp %63 : vector<16x16xf32>
      %cst_42 = arith.constant 9.99999996E-13 : f32
      %65 = vector.broadcast %cst_42 : f32 to vector<16x16xf32>
      %66 = arith.maximumf %64, %65 : vector<16x16xf32>
      %cst_43 = arith.constant 1.000000e+00 : f32
      %67 = vector.broadcast %cst_43 : f32 to vector<16x16xf32>
      %68 = arith.divf %67, %66 : vector<16x16xf32>
      %69 = vector.shape_cast %68 : vector<16x16xf32> to vector<1x16x16xf32>
      %70 = vector.broadcast %69 : vector<1x16x16xf32> to vector<4x16x16xf32>
      %71 = arith.mulf %57, %70 : vector<4x16x16xf32>
      %cst_44 = arith.constant 0.000000e+00 : f32
      %72 = vector.broadcast %cst_44 : f32 to vector<4x2x16xf32>
      %c0_45 = arith.constant 0 : index
      %c0_46 = arith.constant 0 : index
      %c0_47 = arith.constant 0 : index
      %73 = vector.load %arg6[%c0_45, %c0_46, %c0_47] : memref<4x20x16xf32, #tpu.memory_space<vmem>>, vector<4x2x16xf32>
      tpu.vector_store %arg6[%c0_45, %c0_46, %c0_47], %72 {strides = array<i32>} : memref<4x20x16xf32, #tpu.memory_space<vmem>>, vector<4x2x16xf32>,
      %c0_48 = arith.constant 0 : index
      %c18 = arith.constant 18 : index
      %c0_49 = arith.constant 0 : index
      %74 = vector.load %arg6[%c0_48, %c18, %c0_49] : memref<4x20x16xf32, #tpu.memory_space<vmem>>, vector<4x2x16xf32>
      tpu.vector_store %arg6[%c0_48, %c18, %c0_49], %72 {strides = array<i32>} : memref<4x20x16xf32, #tpu.memory_space<vmem>>, vector<4x2x16xf32>,
      %c0_50 = arith.constant 0 : index
      %c2_51 = arith.constant 2 : index
      %c0_52 = arith.constant 0 : index
      %75 = vector.load %arg6[%c0_50, %c2_51, %c0_52] : memref<4x20x16xf32, #tpu.memory_space<vmem>>, vector<4x16x16xf32>
      tpu.vector_store %arg6[%c0_50, %c2_51, %c0_52], %71 {strides = array<i32>} : memref<4x20x16xf32, #tpu.memory_space<vmem>>, vector<4x16x16xf32>,
    } else {
    }
    %c16_i32 = arith.constant 16 : i32
    %3 = arith.muli %arg1, %c16_i32 : i32
    %4 = tpu.assume_multiple %3, 8 : i32
    %c2_i32 = arith.constant 2 : i32
    %5 = arith.addi %c2_i32, %4 : i32
    %c0 = arith.constant 0 : index
    %6 = arith.index_cast %5 : i32 to index
    %c0_1 = arith.constant 0 : index
    %7 = vector.load %arg6[%c0, %6, %c0_1] : memref<4x20x16xf32, #tpu.memory_space<vmem>>, vector<4x16x16xf32>
    %8 = vector.shape_cast %7 : vector<4x16x16xf32> to vector<64x16xf32>
    %c0_2 = arith.constant 0 : index
    %c0_3 = arith.constant 0 : index
    %9 = vector.load %arg3[%c0_2, %c0_3] : memref<16x400xf32, #tpu.memory_space<vmem>>, vector<16x400xf32>
    %cst = arith.constant dense<0.000000e+00> : vector<64x400xf32>
    %10 = tpu.matmul %8, %9, %cst {dimension_numbers = #tpu.dot_dimension_numbers<[1], [0], [0], [1], [0, 0, 1, 1], [], []>} : vector<64x16xf32>, vector<16x400xf32>, vector<64x400xf32> -> vector<64x400xf32>
    %c0_4 = arith.constant 0 : index
    %11 = arith.index_cast %4 : i32 to index
    %c0_5 = arith.constant 0 : index
    %12 = vector.load %arg6[%c0_4, %11, %c0_5] : memref<4x20x16xf32, #tpu.memory_space<vmem>>, vector<4x16x16xf32>
    %13 = vector.shape_cast %12 : vector<4x16x16xf32> to vector<64x16xf32>
    %c0_6 = arith.constant 0 : index
    %c0_7 = arith.constant 0 : index
    %c0_8 = arith.constant 0 : index
    %14 = vector.load %arg4[%c0_6, %c0_7, %c0_8] : memref<5x16x400xf32, #tpu.memory_space<vmem>>, vector<1x16x400xf32>
    %15 = vector.shape_cast %14 : vector<1x16x400xf32> to vector<16x400xf32>
    %cst_9 = arith.constant dense<0.000000e+00> : vector<64x400xf32>
    %16 = tpu.matmul %13, %15, %cst_9 {dimension_numbers = #tpu.dot_dimension_numbers<[1], [0], [0], [1], [0, 0, 1, 1], [], []>} : vector<64x16xf32>, vector<16x400xf32>, vector<64x400xf32> -> vector<64x400xf32>
    %c1_i32 = arith.constant 1 : i32
    %17 = arith.addi %4, %c1_i32 : i32
    %c0_10 = arith.constant 0 : index
    %18 = arith.index_cast %17 : i32 to index
    %c0_11 = arith.constant 0 : index
    %19 = vector.load %arg6[%c0_10, %18, %c0_11] : memref<4x20x16xf32, #tpu.memory_space<vmem>>, vector<4x16x16xf32>
    %20 = vector.shape_cast %19 : vector<4x16x16xf32> to vector<64x16xf32>
    %c1 = arith.constant 1 : index
    %c0_12 = arith.constant 0 : index
    %c0_13 = arith.constant 0 : index
    %21 = vector.load %arg4[%c1, %c0_12, %c0_13] : memref<5x16x400xf32, #tpu.memory_space<vmem>>, vector<1x16x400xf32>
    %22 = vector.shape_cast %21 : vector<1x16x400xf32> to vector<16x400xf32>
    %cst_14 = arith.constant dense<0.000000e+00> : vector<64x400xf32>
    %23 = tpu.matmul %20, %22, %cst_14 {dimension_numbers = #tpu.dot_dimension_numbers<[1], [0], [0], [1], [0, 0, 1, 1], [], []>} : vector<64x16xf32>, vector<16x400xf32>, vector<64x400xf32> -> vector<64x400xf32>
    %24 = arith.addf %16, %23 : vector<64x400xf32>
    %c2_i32_15 = arith.constant 2 : i32
    %25 = arith.addi %4, %c2_i32_15 : i32
    %c0_16 = arith.constant 0 : index
    %26 = arith.index_cast %25 : i32 to index
    %c0_17 = arith.constant 0 : index
    %27 = vector.load %arg6[%c0_16, %26, %c0_17] : memref<4x20x16xf32, #tpu.memory_space<vmem>>, vector<4x16x16xf32>
    %28 = vector.shape_cast %27 : vector<4x16x16xf32> to vector<64x16xf32>
    %c2 = arith.constant 2 : index
    %c0_18 = arith.constant 0 : index
    %c0_19 = arith.constant 0 : index
    %29 = vector.load %arg4[%c2, %c0_18, %c0_19] : memref<5x16x400xf32, #tpu.memory_space<vmem>>, vector<1x16x400xf32>
    %30 = vector.shape_cast %29 : vector<1x16x400xf32> to vector<16x400xf32>
    %cst_20 = arith.constant dense<0.000000e+00> : vector<64x400xf32>
    %31 = tpu.matmul %28, %30, %cst_20 {dimension_numbers = #tpu.dot_dimension_numbers<[1], [0], [0], [1], [0, 0, 1, 1], [], []>} : vector<64x16xf32>, vector<16x400xf32>, vector<64x400xf32> -> vector<64x400xf32>
    %32 = arith.addf %24, %31 : vector<64x400xf32>
    %c3_i32 = arith.constant 3 : i32
    %33 = arith.addi %4, %c3_i32 : i32
    %c0_21 = arith.constant 0 : index
    %34 = arith.index_cast %33 : i32 to index
    %c0_22 = arith.constant 0 : index
    %35 = vector.load %arg6[%c0_21, %34, %c0_22] : memref<4x20x16xf32, #tpu.memory_space<vmem>>, vector<4x16x16xf32>
    %36 = vector.shape_cast %35 : vector<4x16x16xf32> to vector<64x16xf32>
    %c3 = arith.constant 3 : index
    %c0_23 = arith.constant 0 : index
    %c0_24 = arith.constant 0 : index
    %37 = vector.load %arg4[%c3, %c0_23, %c0_24] : memref<5x16x400xf32, #tpu.memory_space<vmem>>, vector<1x16x400xf32>
    %38 = vector.shape_cast %37 : vector<1x16x400xf32> to vector<16x400xf32>
    %cst_25 = arith.constant dense<0.000000e+00> : vector<64x400xf32>
    %39 = tpu.matmul %36, %38, %cst_25 {dimension_numbers = #tpu.dot_dimension_numbers<[1], [0], [0], [1], [0, 0, 1, 1], [], []>} : vector<64x16xf32>, vector<16x400xf32>, vector<64x400xf32> -> vector<64x400xf32>
    %40 = arith.addf %32, %39 : vector<64x400xf32>
    %c4_i32 = arith.constant 4 : i32
    %41 = arith.addi %4, %c4_i32 : i32
    %c0_26 = arith.constant 0 : index
    %42 = arith.index_cast %41 : i32 to index
    %c0_27 = arith.constant 0 : index
    %43 = vector.load %arg6[%c0_26, %42, %c0_27] : memref<4x20x16xf32, #tpu.memory_space<vmem>>, vector<4x16x16xf32>
    %44 = vector.shape_cast %43 : vector<4x16x16xf32> to vector<64x16xf32>
    %c4 = arith.constant 4 : index
    %c0_28 = arith.constant 0 : index
    %c0_29 = arith.constant 0 : index
    %45 = vector.load %arg4[%c4, %c0_28, %c0_29] : memref<5x16x400xf32, #tpu.memory_space<vmem>>, vector<1x16x400xf32>
    %46 = vector.shape_cast %45 : vector<1x16x400xf32> to vector<16x400xf32>
    %cst_30 = arith.constant dense<0.000000e+00> : vector<64x400xf32>
    %47 = tpu.matmul %44, %46, %cst_30 {dimension_numbers = #tpu.dot_dimension_numbers<[1], [0], [0], [1], [0, 0, 1, 1], [], []>} : vector<64x16xf32>, vector<16x400xf32>, vector<64x400xf32> -> vector<64x400xf32>
    %48 = arith.addf %40, %47 : vector<64x400xf32>
    %49 = arith.mulf %10, %48 : vector<64x400xf32>
    %50 = vector.shape_cast %49 : vector<64x400xf32> to vector<4x16x400xf32>
    %c0_31 = arith.constant 0 : index
    %c0_32 = arith.constant 0 : index
    %c0_33 = arith.constant 0 : index
    %c0_34 = arith.constant 0 : index
    %51 = vector.load %arg5[%c0_31, %c0_32, %c0_33, %c0_34] : memref<1x4x16x400xf32, #tpu.memory_space<vmem>>, vector<1x4x16x400xf32>
    %52 = vector.shape_cast %51 : vector<1x4x16x400xf32> to vector<4x16x400xf32>
    %53 = vector.shape_cast %50 : vector<4x16x400xf32> to vector<1x4x16x400xf32>
    tpu.vector_store %arg5[%c0_31, %c0_32, %c0_33, %c0_34], %53 {strides = array<i32>} : memref<1x4x16x400xf32, #tpu.memory_space<vmem>>, vector<1x4x16x400xf32>,
    return
  }
  func.func @transform_0(%arg0: i32, %arg1: i32) -> (i32, i32, i32, i32) {
    %c0_i32 = arith.constant 0 : i32
    %c0_i32_0 = arith.constant 0 : i32
    %c0_i32_1 = arith.constant 0 : i32
    %c0_i32_2 = arith.constant 0 : i32
    return %arg0, %c0_i32, %c0_i32_0, %c0_i32_1 : i32, i32, i32, i32
  }
  func.func @transform_1(%arg0: i32, %arg1: i32) -> (i32, i32) {
    %c0_i32 = arith.constant 0 : i32
    %c0_i32_0 = arith.constant 0 : i32
    %c0_i32_1 = arith.constant 0 : i32
    return %c0_i32, %c0_i32_0 : i32, i32
  }
  func.func @transform_2(%arg0: i32, %arg1: i32) -> (i32, i32, i32) {
    %c0_i32 = arith.constant 0 : i32
    %c0_i32_0 = arith.constant 0 : i32
    %c0_i32_1 = arith.constant 0 : i32
    %c0_i32_2 = arith.constant 0 : i32
    return %c0_i32, %c0_i32_0, %c0_i32_1 : i32, i32, i32
  }
  func.func @transform_3(%arg0: i32, %arg1: i32) -> (i32, i32, i32, i32) {
    %c0_i32 = arith.constant 0 : i32
    %c0_i32_0 = arith.constant 0 : i32
    %c0_i32_1 = arith.constant 0 : i32
    return %arg0, %c0_i32, %arg1, %c0_i32_0 : i32, i32, i32, i32
  }
}

</mosaic_0001>

<bundles_post_ra>
// kernel: tpu_custom_call.1
= control target key start
LH: loop header
LB: loop body
LE: loop exit
PB: predicated region body
PF: predicated region fallthrough
CT: control target
= control target key end

     0   :  { %8 = vsyncpa [#allocation4], 0  ;;  %s3469_s0 = inlined_call_operand.hbm [shape: f32[2,4,16,16], index: 0, kind: input, shape index: {}]   ;;  %s3470_s1 = inlined_call_operand.hbm [shape: f32[16,400], index: 1, kind: input, shape index: {}]   ;;  %s3471_s2 = inlined_call_operand.hbm [shape: f32[5,16,400], index: 2, kind: input, shape index: {}]   ;;  %s3472_s3 = inlined_call_operand.hbm [shape: f32[2,4,16,400], index: 3, kind: output, shape index: {}]  }
   0x1   :  { %10 = vsyncpa [#allocation4 + $0x1], 0 }
   0x2   :  { %11 = vsyncpa [#allocation7], 0 }
   0x3   :  { %12 = vsyncpa [#allocation5], 0 }
   0x4   :  { %14 = vsyncpa [#allocation5 + $0x1], 0  ;;  %s2830_s12 = smov 0   ;;  %s2832_s13 = smov 0  }
   0x5   :  { %s2834_s14 = smov 0   ;;  %s2836_s15 = smov 0  }
   0x6   :  { %s2838_s16 = smov 0   ;;  %s2840_s17 = smov 0  }
   0x7 LB: > { %s2198_s18 = sadd.s32 4294967295, %s2797_s17   ;;  %s2199_s19 = sadd.s32 4294967294, %s2797_s17   ;;  %s2797_s17 = sphi %s2840_s17, %s20_s17   ;;  %s2793_s16 = sphi %s2838_s16, %s3494_s16   ;;  %s2789_s15 = sphi %s2836_s15, %s3493_s15   ;;  %s2785_s14 = sphi %s2834_s14, %s3492_s14   ;;  %s2781_s13 = sphi %s2832_s13, %s3491_s13   ;;  %s2777_s12 = sphi %s2830_s12, %s3490_s12  }
   0x8   : > { %p52_p0 = scmp.ne.s32.totalorder %s2781_s13, %s2777_s12  ;;  %p2864_p1 = scmp.eq.s32.totalorder %s2198_s18, 0 }
   0x9   : > { %p2868_p2 = scmp.eq.s32.totalorder %s2198_s18, 1  ;;  %p126_p3 = scmp.eq.s32.totalorder %s2199_s19, 1 }
   0xa   : > { %s3477_s20 = scalar_select %p2864_p1, 1, 0 }
   0xb   : > { %p2874_p4 = por %p2864_p1, %p52_p0  ;;  %p2200_p5 = scmp.ge.s32.totalorder %s2797_s17, 1 }
   0xc   : > { %p2879_p6 = por %p126_p3, %p52_p0  ;;  %p133_p7 = scmp.lt.s32.totalorder %s2797_s17, 3 }
   0xd   : > { %s3479_s22 = scalar_select %p2874_p4, 1, 0 }
   0xe   : > { %s3480_s23 = scalar_select %p2879_p6, 1, 0 }
   0xf   : > { %p2884_p8 = pnand %p2200_p5, %p133_p7  ;;  %s2799_s25 = smov [#allocation6]  }
  0x10   : > { %s145_s26 = sshll.u32 %s2799_s25, 4  ;;  %s2800_s28 = smov [#allocation8]   ;;  %s2888_s26 = int_to_ptr.vmem [resolvable:$true] %s145_s26 }
  0x11   : > { %p2535_p9 = pneg %p2884_p8  ;;  %s158_s29 = sshll.u32 %s2800_s28, 4  ;;  %s2899_s29 = int_to_ptr.vmem [resolvable:$true] %s158_s29 }
  0x12   : > { %s2625_s5 = scalar_lea.hbm %s3470_s1, 1024 }
  0x13   : > { %p2895_p11 = pnand %p2535_p9, %p2864_p1  ;;  %p2626_p12 = scmp.ne.s32.totalorder %s3470_s1, %s2625_s5 }
  0x14   : > { %p2632_p5 = scmp.lt.u32.totalorder %s2625_s5, %s3470_s1 }
  0x15   : > { %p2627_p13 = pneg %p2895_p11 }
  0x17   : > { %p2628_p0 = pnand %p2627_p13, %p2626_p12 }
  0x19   : > { %p2629_p3 = pneg %p2628_p0 }
  0x1b   : > { %p2634_p7 = pnand %p2632_p5, %p2629_p3 }
  0x1d   : > { %2637 = shalt.err (!%p2634_p7)
}
  0x1e   : > { %s2638_s10 = scalar_lea.vmem %s2888_s26, 1024  ;;  %p2646_p1 = scmp.lt.s32.totalorder %s2888_s26, %s2888_s26 }
  0x1f   : > { %p2639_p9 = scmp.ne.s32.totalorder %s2888_s26, %s2638_s10  ;;  %p2647_p12 = scmp.lt.s32.totalorder %s2638_s10, %s2638_s10 }
  0x21   : > { %p2641_p10 = pnand %p2639_p9, %p2627_p13  ;;  %p2648_p0 = por %p2647_p12, %p2646_p1 }
  0x23   : > { %p2642_p6 = pneg %p2641_p10 }
  0x25   : > { %p2649_p4 = pnand %p2648_p0, %p2642_p6 }
  0x27   : > { %2652 = shalt.err (!%p2649_p4)
}
  0x28   : > { %s2801_s11 = smov 512   ;;  %s2802_s18 = smov 32  }
  0x29   : > { %2538 = dma.hbm_to_vmem [thread:$0]  (!%p2895_p11), %s3470_s1, 1024, %s2888_s26, [#allocation7], %s2801_s11, %s2801_s11, %s2802_s18  }
  0x2a   : > { %s2653_s4 = scalar_lea.hbm %s3471_s2, 5120 }
  0x2b   : > { %p2654_p1 = scmp.ne.s32.totalorder %s3471_s2, %s2653_s4  ;;  %p2660_p10 = scmp.lt.u32.totalorder %s2653_s4, %s3471_s2 }
  0x2d   : > { %p2656_p4 = pnand %p2654_p1, %p2627_p13 }
  0x2f   : > { %p2657_p6 = pneg %p2656_p4 }
  0x31   : > { %p2662_p3 = pnand %p2660_p10, %p2657_p6 }
  0x33   : > { %2665 = shalt.err (!%p2662_p3)
}
  0x34   : > { %s2666_s26 = scalar_lea.vmem %s2899_s29, 5120  ;;  %p2674_p12 = scmp.lt.s32.totalorder %s2899_s29, %s2899_s29 }
  0x35   : > { %p2667_p5 = scmp.ne.s32.totalorder %s2899_s29, %s2666_s26  ;;  %p2675_p0 = scmp.lt.s32.totalorder %s2666_s26, %s2666_s26 }
  0x37   : > { %p2669_p7 = pnand %p2667_p5, %p2627_p13  ;;  %p2676_p1 = por %p2675_p0, %p2674_p12 }
  0x39   : > { %p2670_p9 = pneg %p2669_p7 }
  0x3b   : > { %p2677_p4 = pnand %p2676_p1, %p2670_p9 }
  0x3d   : > { %2680 = shalt.err (!%p2677_p4)
}
  0x3e   : > { %2541 = dma.hbm_to_vmem [thread:$0]  (!%p2895_p11), %s3471_s2, 5120, %s2899_s29, [#allocation7], %s2801_s11, %s2801_s11, %s2802_s18  }
  0x3f   : > { %s32_s19 = sadd.s32 1, %s2793_s16  ;;  %s39_s25 = sadd.s32 1, %s2785_s14 }
  0x40   : > { %p34_p13 = scmp.ge.s32.totalorder %s32_s19, 2  ;;  %p46_p6 = scmp.ne.s32.totalorder %s2785_s14, %s2781_s13 }
  0x41   : > { %p47_p10 = scmp.eq.s32.totalorder %s2797_s17, 0  ;;  %p2552_p3 = scmp.lt.s32.totalorder %s2797_s17, 2 }
  0x42   : > { %s3496_s19 = smov (%p34_p13, %s32_s19), 0  ;;  %p2963_p7 = por %p2868_p2, %p46_p6 }
  0x43   : > { %p48_p5 = por %p47_p10, %p46_p6  ;;  %s36_s28 = ssub.s32 %s2793_s16, %s3496_s19 }
  0x44   : > { %s3483_s27 = scalar_select %p2963_p7, 1, 0 }
  0x45   : > { %s172_s30 = sand.u32 1, %s2785_s14   ;;  %p37_p9 = scmp.eq.s32.totalorder %s36_s28, 0 }
  0x46   : > { %s2204_s29 = sshll.u32 %s172_s30, 6  ;;  %s2345_s11 = sshll.u32 %s2793_s16, 10 }
  0x47   : > { %s2972_s18 = scalar_select %p37_p9, %s2785_s14, %s39_s25  }
  0x48   : > { %s2977_s6 = scalar_lea.hbm %s3469_s0, %s2345_s11  ;;  %s176_s21 = scalar_lea.vmem [#allocation3], %s2204_s29 }
  0x49   : > { %s183_s7 = sshll.u32 %s176_s21, 4  ;;  %p2981_p2 = pnand %p2552_p3, %p48_p5  ;;  %s2985_s7 = int_to_ptr.vmem [resolvable:$true] %s183_s7 }
  0x4a   : > { %s2987_s26 = scalar_lea.sflag [#allocation4], %s172_s30  ;;  %s2681_s9 = scalar_lea.hbm %s2977_s6, 1024 }
  0x4b   : > { %p2682_p11 = scmp.ne.s32.totalorder %s2977_s6, %s2681_s9  ;;  %p2683_p12 = pneg %p2981_p2 }
  0x4c   : > { %s2686_s28 = scalar_lea.hbm %s3469_s0, 2048  ;;  %p2687_p4 = scmp.lt.u32.totalorder %s2977_s6, %s3469_s0 }
  0x4d   : > { %p2684_p0 = pnand %p2683_p12, %p2682_p11  ;;  %p2688_p13 = scmp.lt.u32.totalorder %s2686_s28, %s2681_s9 }
  0x4e   : > { %p2690_p10 = scmp.lt.u32.totalorder %s2681_s9, %s2977_s6 }
  0x4f   : > { %p2685_p1 = pneg %p2684_p0  ;;  %p2689_p6 = por %p2688_p13, %p2687_p4 }
  0x51   : > { %p2691_p3 = por %p2690_p10, %p2689_p6 }
  0x53   : > { %p2692_p5 = pnand %p2691_p3, %p2685_p1 }
  0x55   : > { %2695 = shalt.err (!%p2692_p5)
}
  0x56   : > { %s2696_s30 = scalar_lea.vmem %s2985_s7, 1024  ;;  %s2803_s4 = smov [#allocation3]  }
  0x57   : > { %p2697_p9 = scmp.ne.s32.totalorder %s2985_s7, %s2696_s30  ;;  %s2701_s5 = sshll.u32 %s2803_s4, 4  ;;  %s2702_s5 = int_to_ptr.vmem [resolvable:$false] %s2701_s5 }
  0x58   : > { %s2703_s21 = scalar_lea.vmem %s2702_s5, 2048  ;;  %p2704_p7 = scmp.lt.s32.totalorder %s2985_s7, %s2702_s5 }
  0x59   : > { %p2699_p11 = pnand %p2697_p9, %p2683_p12  ;;  %p2705_p4 = scmp.lt.s32.totalorder %s2703_s21, %s2696_s30 }
  0x5b   : > { %p2700_p0 = pneg %p2699_p11  ;;  %p2706_p13 = por %p2705_p4, %p2704_p7 }
  0x5d   : > { %p2707_p6 = pnand %p2706_p13, %p2700_p0 }
  0x5f   : > { %2710 = shalt.err (!%p2707_p6)
}
  0x60   : > { %s2804_s9 = smov 128   ;;  %s2805_s10 = smov 8  }
  0x61   : > { %2545 = dma.hbm_to_vmem [thread:$0]  (!%p2981_p2), %s2977_s6, 1024, %s2985_s7, %s2987_s26, %s2804_s9, %s2804_s9, %s2805_s10  }
  0x62   : > { %195 = sbr.rel (%p2884_p8) target bundleno = 598 (0x256), region = 32  ;;  %s3018_s25 = sand.u32 (!%p2884_p8), 1, %s2781_s13  }
  0x63   : > { %s2208_s28 = sshll.u32 (!%p2884_p8), %s3018_s25, 6  ;;  %s198_s29 = scalar_lea.sflag (!%p2884_p8), [#allocation4], %s3018_s25 }
  0x64   : > { %s3022_s11 = scalar_lea.vmem (!%p2884_p8), [#allocation3], %s2208_s28  ;;  %p3485_p7 = scmp.ne.s32.totalorder (!%p2884_p8), %s3479_s22, 0 }
  0x69   : > { %2764 = dma.done.wait (%p3485_p7), %s198_s29, 1024  }
  0x6a   : > { %2766 = vsyncadd (%p3485_p7), %s198_s29, 4294966272  ;;  %p3486_p2 = scmp.ne.s32.totalorder %s3477_s20, 0 }
  0x6c   : > { %2768 = dma.done.wait (%p3486_p2), [#allocation7], 6144  }
  0x6d   : > { %2770 = vsyncadd (%p3486_p2), [#allocation7], 4294961152  ;;  %vm308_vm0 = vcmask 123904   ;;  %v2806_v0 = vmov 0.0   ;;  %v337_v1 = vld [vmem:[#allocation6 + $0x8] sm:$0xff]  ;;  %v339_v3 = vld [vmem:[#allocation6 + $0x18] sm:$0xff] }
  0x6e   : > { %433 = vmatprep.mubr.f32.mxu0 %v2806_v0  ;;  %546 = vmatprep.mubr.f32.mxu1 %v2806_v0  ;;  %309 = vst.msk [vmem:[#allocation2] sm:$0x3] %vm308_vm0, %v2806_v0  ;;  %310 = vst.msk [vmem:[#allocation2 + $0x18] sm:$0x3] %vm308_vm0, %v2806_v0  ;;  %v341_v2 = vld [vmem:[#allocation6 + $0x28] sm:$0xff]  ;;  %v343_v5 = vld [vmem:[#allocation6 + $0x38] sm:$0xff] }
  0x6f   : > { %311 = vst.msk [vmem:[#allocation2 + $0x30] sm:$0x3] %vm308_vm0, %v2806_v0  ;;  %312 = vst.msk [vmem:[#allocation2 + $0x48] sm:$0x3] %vm308_vm0, %v2806_v0  ;;  %v2347_v4 = vpack.c.bf16 %v341_v2, %v337_v1  ;;  %v336_v6 = vld [vmem:[#allocation6] sm:$0xff]  ;;  %v2351_v8 = vpack.c.bf16 %v343_v5, %v339_v3  ;;  %v338_v10 = vld [vmem:[#allocation6 + $0x10] sm:$0xff] }
  0x70   : > { %313 = vst.msk [vmem:[#allocation2 + $0x12] sm:$0x3] %vm308_vm0, %v2806_v0  ;;  %314 = vst.msk [vmem:[#allocation2 + $0x2a] sm:$0x3] %vm308_vm0, %v2806_v0  ;;  %v340_v7 = vld [vmem:[#allocation6 + $0x20] sm:$0xff]  ;;  %v342_v11 = vld [vmem:[#allocation6 + $0x30] sm:$0xff] }
  0x71   : > { %315 = vst.msk [vmem:[#allocation2 + $0x42] sm:$0x3] %vm308_vm0, %v2806_v0  ;;  %316 = vst.msk [vmem:[#allocation2 + $0x5a] sm:$0x3] %vm308_vm0, %v2806_v0  ;;  %v2349_v9 = vpack.c.bf16 %v340_v7, %v336_v6  ;;  %v624_v12 = vld [vmem:[#allocation8 + $0x48] sm:$0xff]  ;;  %2348 = vmatprep.subr.bf16.mxu0 %v2347_v4  ;;  %v2353_v13 = vpack.c.bf16 %v342_v11, %v338_v10  ;;  %v626_v15 = vld [vmem:[#allocation8 + $0x58] sm:$0xff]  ;;  %2352 = vmatprep.subr.bf16.mxu1 %v2351_v8 }
  0x72   : > { %v628_v14 = vld [vmem:[#allocation8 + $0x68] sm:$0xff]  ;;  %v630_v16 = vld [vmem:[#allocation8 + $0x78] sm:$0xff]  ;;  %v237_v19 = vld [vmem:[%s3022_s11] sm:$0xff]  ;;  %vm269_vm1 = vcmask 130048   ;;  %s2211_s20 = sshll.u32 %s3018_s25, 8  ;;  %s2346_s24 = sshll.u32 %s2789_s15, 12 }
  0x73   : > { %2350 = vmatpush1.bf16.msra.mxu0 %v2349_v9  ;;  %v2355_v17 = vpack.c.bf16 %v628_v14, %v624_v12  ;;  %v2359_v18 = vpack.c.bf16 %v630_v16, %v626_v15  ;;  %v239_v20 = vld [vmem:[%s3022_s11 + $0x10] sm:$0xff]  ;;  %v241_v21 = vld [vmem:[%s3022_s11 + $0x20] sm:$0xff]  ;;  %2354 = vmatpush1.bf16.msra.mxu1 %v2353_v13  ;;  %v3046_v23 = vmax.f32 %v237_v19, 0.0  ;;  %v238_v27 = vld [vmem:[%s3022_s11 + $0x8] sm:$0xff]  ;;  %s3355_s22 = scalar_lea.vmem [#allocation9], %s2211_s20  ;;  %s3411_s8 = scalar_lea.hbm %s3472_s3, %s2346_s24 }
  0x74   : > { %v243_v22 = vld [vmem:[%s3022_s11 + $0x30] sm:$0xff]  ;;  %v3048_v24 = vmax.f32 %v239_v20, 0.0  ;;  %v3050_v25 = vmax.f32 %v241_v21, 0.0  ;;  %v240_v31 = vld [vmem:[%s3022_s11 + $0x18] sm:$0xff]  ;;  %v242_v32 = vld [vmem:[%s3022_s11 + $0x28] sm:$0xff]  ;;  %v246_v35 = vmax.f32 %v238_v27, 0.0 }
  0x75   : > { %2356 = vmatprep.subr.bf16.mxu0 %v2355_v17  ;;  %2360 = vmatprep.subr.bf16.mxu1 %v2359_v18  ;;  %v251_v26 = vmax.f32 %v243_v22, 0.0  ;;  %v253_v28 = vmul.f32 %v3046_v23, %v3046_v23  ;;  %v244_v33 = vld [vmem:[%s3022_s11 + $0x38] sm:$0xff]  ;;  %v248_v36 = vmax.f32 %v240_v31, 0.0  ;;  %v250_v37 = vmax.f32 %v242_v32, 0.0  ;;  %v623_v20 = vld [vmem:[#allocation8 + $0x40] sm:$0xff]  ;;  %s2081_s6 = sshll.u32 %s3355_s22, 4  ;;  %s3413_s6 = int_to_ptr.vmem [resolvable:$true] %s2081_s6 }
  0x76   : > { %v255_v29 = vmul.f32 %v3048_v24, %v3048_v24  ;;  %v257_v30 = vmul.f32 %v3050_v25, %v3050_v25  ;;  %v252_v41 = vmax.f32 %v244_v33, 0.0  ;;  %v254_v43 = vmul.f32 %v246_v35, %v246_v35  ;;  %v611_v31 = vld [vmem:[#allocation8 + $0x38] sm:$0xff]  ;;  %s2065_s26 = scalar_lea.sflag [#allocation5], %s3018_s25  ;;  %s2711_s30 = scalar_lea.vmem %s3413_s6, 4096 }
  0x77   : > { %v259_v34 = vmul.f32 %v251_v26, %v251_v26  ;;  %v261_v38 = vmul.f32 %v253_v28, %v3046_v23  ;;  %v256_v44 = vmul.f32 %v248_v36, %v248_v36  ;;  %v258_v45 = vmul.f32 %v250_v37, %v250_v37  ;;  %p2712_p8 = scmp.ne.s32.totalorder %s3413_s6, %s2711_s30  ;;  %p3487_p12 = scmp.ne.s32.totalorder %s3483_s27, 0 }
  0x78   : > { %v263_v39 = vmul.f32 %v255_v29, %v3048_v24  ;;  %v265_v40 = vmul.f32 %v257_v30, %v3050_v25  ;;  %v260_v49 = vmul.f32 %v252_v41, %v252_v41  ;;  %v262_v51 = vmul.f32 %v254_v43, %v246_v35  ;;  %v625_v29 = vld [vmem:[#allocation8 + $0x50] sm:$0xff]  ;;  %v607_v30 = vld [vmem:[#allocation8 + $0x18] sm:$0xff]  ;;  %s2807_s4 = smov [#allocation9]  }
  0x79   : > { %v267_v42 = vmul.f32 %v259_v34, %v251_v26  ;;  %v270_v46 = vsel %vm269_vm1, %v261_v38, 0.0  ;;  %v264_v52 = vmul.f32 %v256_v44, %v248_v36  ;;  %v266_v54 = vmul.f32 %v258_v45, %v250_v37  ;;  %v604_v44 = vld [vmem:[#allocation8] sm:$0xff]  ;;  %p2713_p1 = pnand %p2712_p8, %p3487_p12  ;;  %s2715_s5 = sshll.u32 %s2807_s4, 4  ;;  %s2716_s5 = int_to_ptr.vmem [resolvable:$false] %s2715_s5 }
  0x7a   : > { %v271_v47 = vsel %vm269_vm1, %v263_v39, 0.0  ;;  %v273_v48 = vsel %vm269_vm1, %v265_v40, 0.0  ;;  %v268_v55 = vmul.f32 %v260_v49, %v252_v41  ;;  %v277_v57 = vsel %vm269_vm1, %v262_v51, 0.0  ;;  %v608_v45 = vld [vmem:[#allocation8 + $0x20] sm:$0xff]  ;;  %v1137_v49 = vld [vmem:[#allocation8 + $0xa8] sm:$0xff]  ;;  %v1139_v51 = vld [vmem:[#allocation8 + $0xb8] sm:$0xff]  ;;  %p2718_p3 = scmp.lt.s32.totalorder %s3413_s6, %s2716_s5 }
  0x7b   : > { %v272_v50 = vadd.f32 %v271_v47, %v270_v46  ;;  %v275_v53 = vsel %vm269_vm1, %v267_v42, 0.0  ;;  %v278_v58 = vsel %vm269_vm1, %v264_v52, 0.0  ;;  %v280_v60 = vsel %vm269_vm1, %v266_v54, 0.0  ;;  %v606_v46 = vld [vmem:[#allocation8 + $0x10] sm:$0xff]  ;;  %p2714_p10 = pneg %p2713_p1  ;;  %s2717_s21 = scalar_lea.vmem %s2716_s5, 8192 }
  0x7c   : > { %v279_v59 = vadd.f32 %v278_v58, %v277_v57  ;;  %v282_v62 = vsel %vm269_vm1, %v268_v55, 0.0  ;;  %v610_v47 = vld [vmem:[#allocation8 + $0x30] sm:$0xff]  ;;  %p2719_p5 = scmp.lt.s32.totalorder %s2717_s21, %s2711_s30 }
  0x7d   : > { %v274_v56 = vadd.f32 %v273_v48, %v272_v50  ;;  %v1133_v48 = vld [vmem:[#allocation8 + $0x88] sm:$0xff]  ;;  %v1135_v50 = vld [vmem:[#allocation8 + $0x98] sm:$0xff]  ;;  %v2369_v54 = vpack.c.bf16 %v610_v47, %v606_v46 }
  0x7e   : > { %v281_v63 = vadd.f32 %v280_v60, %v279_v59  ;;  %v2371_v55 = vpack.c.bf16 %v1137_v49, %v1133_v48  ;;  %p2720_p9 = por %p2719_p5, %p2718_p3 }
  0x7f   : > { %v276_v61 = vadd.f32 %v275_v53, %v274_v56  ;;  %v2365_v53 = vpack.c.bf16 %v608_v45, %v604_v44  ;;  %v2375_v56 = vpack.c.bf16 %v1139_v51, %v1135_v50 }
  0x80   : > { %v283_v1 = vadd.f32 %v282_v62, %v281_v63  ;;  %p2721_p11 = pnand %p2720_p9, %p2714_p10 }
  0x81   : > { %2613 = vlog2.f32 %v276_v61 }
  0x82   : > { %2615 = vlog2.f32 %v283_v1  ;;  %v1132_v1 = vld [vmem:[#allocation8 + $0x80] sm:$0xff] }
  0x8b   : > { %v2614_v2 = vpop.eup %2613 }
  0x8c   : > { %v285_v3 = vmul.f32 0.6931472, %v2614_v2  ;;  %v2616_v4 = vpop.eup %2615  ;;  %v1136_v2 = vld [vmem:[#allocation8 + $0xa0] sm:$0xff] }
  0x8d   : > { %v287_v6 = vmul.f32 0.6931472, %v2616_v4  ;;  %v1138_v4 = vld [vmem:[#allocation8 + $0xb0] sm:$0xff] }
  0x8e   : > { %v288_v5 = vmul.f32 0.33333334, %v285_v3  ;;  %v1134_v3 = vld [vmem:[#allocation8 + $0x90] sm:$0xff] }
  0x8f   : > { %v289_v8 = vmul.f32 0.33333334, %v287_v6  ;;  %v1414_v6 = vld [vmem:[#allocation8 + $0xe8] sm:$0xff] }
  0x90   : > { %v290_v7 = vmul.f32 1.442695, %v288_v5  ;;  %v1410_v5 = vld [vmem:[#allocation8 + $0xc8] sm:$0xff] }
  0x91   : > { %v292_v9 = vmul.f32 1.442695, %v289_v8  ;;  %v1416_v8 = vld [vmem:[#allocation8 + $0xf8] sm:$0xff] }
  0x92   : > { %2617 = vpow2.f32 %v290_v7  ;;  %v1412_v7 = vld [vmem:[#allocation8 + $0xd8] sm:$0xff] }
  0x93   : > { %2619 = vpow2.f32 %v292_v9 }
  0x9c   : > { %v2618_v10 = vpop.eup %2617 }
  0x9d   : > { %v294_v11 = vmax.f32 %v2618_v10, 1e-12  ;;  %v2620_v12 = vpop.eup %2619  ;;  %v2373_v10 = vpack.c.bf16 %v1136_v2, %v1132_v1 }
  0x9e   : > { %v295_v13 = vmax.f32 %v2620_v12, 1e-12  ;;  %v2379_v12 = vpack.c.bf16 %v1414_v6, %v1410_v5 }
  0x9f   : > { %2621 = vrcp.f32 %v294_v11  ;;  %v2377_v11 = vpack.c.bf16 %v1138_v4, %v1134_v3 }
  0xa0   : > { %2623 = vrcp.f32 %v295_v13  ;;  %v2383_v13 = vpack.c.bf16 %v1416_v8, %v1412_v7 }
  0xa9   : > { %v2622_v14 = vpop.eup %2621 }
  0xaa   : > { %v300_v15 = vmul.f32 %v2622_v14, %v3046_v23  ;;  %v302_v16 = vmul.f32 %v2622_v14, %v3048_v24  ;;  %v304_v17 = vmul.f32 %v2622_v14, %v3050_v25  ;;  %v306_v18 = vmul.f32 %v2622_v14, %v251_v26  ;;  %v2624_v19 = vpop.eup %2623  ;;  %v627_v23 = vld [vmem:[#allocation8 + $0x60] sm:$0xff]  ;;  %v629_v24 = vld [vmem:[#allocation8 + $0x70] sm:$0xff]  ;;  %v605_v25 = vld [vmem:[#allocation8 + $0x8] sm:$0xff] }
  0xab   : > { %v301_v21 = vmul.f32 %v2624_v19, %v246_v35  ;;  %v303_v22 = vmul.f32 %v2624_v19, %v248_v36  ;;  %v305_v27 = vmul.f32 %v2624_v19, %v250_v37  ;;  %v307_v28 = vmul.f32 %v2624_v19, %v252_v41  ;;  %v609_v26 = vld [vmem:[#allocation8 + $0x28] sm:$0xff] }
  0xac   : > { %317 = vst.msk [vmem:[#allocation2 + $0x2] sm:$0xff] %vm269_vm1, %v300_v15  ;;  %319 = vst.msk [vmem:[#allocation2 + $0x1a] sm:$0xff] %vm269_vm1, %v302_v16  ;;  %v2357_v32 = vpack.c.bf16 %v627_v23, %v623_v20  ;;  %v2361_v33 = vpack.c.bf16 %v629_v24, %v625_v29  ;;  %v2363_v35 = vpack.c.bf16 %v609_v26, %v605_v25  ;;  %v1711_v23 = vld [vmem:[#allocation8 + $0x108] sm:$0xff]  ;;  %v1713_v24 = vld [vmem:[#allocation8 + $0x118] sm:$0xff] }
  0xad   : > { %321 = vst.msk [vmem:[#allocation2 + $0x32] sm:$0xff] %vm269_vm1, %v304_v17  ;;  %323 = vst.msk [vmem:[#allocation2 + $0x4a] sm:$0xff] %vm269_vm1, %v306_v18  ;;  %v2367_v36 = vpack.c.bf16 %v611_v31, %v607_v30  ;;  %v1715_v29 = vld [vmem:[#allocation8 + $0x128] sm:$0xff]  ;;  %v1717_v25 = vld [vmem:[#allocation8 + $0x138] sm:$0xff] }
  0xae   : > { %318 = vst.msk [vmem:[#allocation2 + $0xa] sm:$0xff] %vm269_vm1, %v301_v21  ;;  %320 = vst.msk [vmem:[#allocation2 + $0x22] sm:$0xff] %vm269_vm1, %v303_v22  ;;  %v1409_v21 = vld [vmem:[#allocation8 + $0xc0] sm:$0xff]  ;;  %v2387_v31 = vpack.c.bf16 %v1715_v29, %v1711_v23 }
  0xaf   : > { %322 = vst.msk [vmem:[#allocation2 + $0x3a] sm:$0xff] %vm269_vm1, %v305_v27  ;;  %324 = vst.msk [vmem:[#allocation2 + $0x52] sm:$0xff] %vm269_vm1, %v307_v28  ;;  %v1413_v22 = vld [vmem:[#allocation8 + $0xe0] sm:$0xff]  ;;  %v1411_v27 = vld [vmem:[#allocation8 + $0xd0] sm:$0xff] }
  0xb0   : > { %v1415_v28 = vld [vmem:[#allocation8 + $0xf0] sm:$0xff]  ;;  %v2381_v26 = vpack.c.bf16 %v1413_v22, %v1409_v21 }
  0xb1   : > { %v2385_v30 = vpack.c.bf16 %v1415_v28, %v1411_v27 }
  0xb3   : > { %v3084_v34 = vld [vmem:[#allocation2 + $0x2] sm:$0xff]  ;;  %v3100_v38 = vld [vmem:[#allocation2 + $0x1a] sm:$0xff] }
  0xb4   : > { %2220 = vmatmul.mubr.msk.f32.vlgmr.msra.gmra.mrb[0].mxu0 %vm269_vm1, %v3084_v34  ;;  %2228 = vmatmul.mubr.msk.f32.vlgmr.msra.gmra.mrb[0].mxu1 %vm269_vm1, %v3084_v34  ;;  %v3116_v40 = vld [vmem:[#allocation2 + $0x32] sm:$0xff]  ;;  %v3132_v42 = vld [vmem:[#allocation2 + $0x4a] sm:$0xff]  ;;  %v2236_v52 = vld [vmem:[#allocation2 + $0x1] sm:$0xff] }
  0xb5   : > { %2358 = vmatpush1.bf16.msra.mxu0 %v2357_v32  ;;  %2362 = vmatpush1.bf16.msra.mxu1 %v2361_v33  ;;  %v3092_v37 = vld [vmem:[#allocation2 + $0xa] sm:$0xff]  ;;  %v3108_v39 = vld [vmem:[#allocation2 + $0x22] sm:$0xff]  ;;  %v2238_v58 = vld [vmem:[#allocation2 + $0x19] sm:$0xff]  ;;  %v2391_v32 = vpack.c.bf16 %v1717_v25, %v1713_v24 }
  0xb6   : > { %439 = vmatprep.mubr.f32.mxu0 %v2806_v0  ;;  %552 = vmatprep.mubr.f32.mxu1 %v2806_v0  ;;  %v3124_v41 = vld [vmem:[#allocation2 + $0x3a] sm:$0xff]  ;;  %v3140_v43 = vld [vmem:[#allocation2 + $0x52] sm:$0xff]  ;;  %v2237_v57 = vld [vmem:[#allocation2 + $0x9] sm:$0xff] }
  0xb7   : > { %2364 = vmatprep.subr.bf16.mxu0 %v2363_v35  ;;  %2368 = vmatprep.subr.bf16.mxu1 %v2367_v36  ;;  %v2239_v59 = vld [vmem:[#allocation2 + $0x21] sm:$0xff]  ;;  %v2240_v60 = vld [vmem:[#allocation2 + $0x31] sm:$0xff]  ;;  %v2241_v61 = vld [vmem:[#allocation2 + $0x39] sm:$0xff] }
  0xb8   : > { %2221 = vmatmul.mubr.msk.f32.gmra.mrb[2].mxu0 %vm269_vm1, %v3092_v37  ;;  %2229 = vmatmul.mubr.msk.f32.gmra.mrb[2].mxu1 %vm269_vm1, %v3092_v37  ;;  %v2242_v62 = vld [vmem:[#allocation2 + $0x49] sm:$0xff]  ;;  %v2243_v63 = vld [vmem:[#allocation2 + $0x51] sm:$0xff]  ;;  %v596_v9 = vld [vmem:[#allocation2] sm:$0xff] }
  0xb9   : > { %445 = vmatprep.mubr.f32.mxu0 %v2806_v0  ;;  %558 = vmatprep.mubr.f32.mxu1 %v2806_v0  ;;  %v597_v14 = vld [vmem:[#allocation2 + $0x8] sm:$0xff]  ;;  %v598_v15 = vld [vmem:[#allocation2 + $0x18] sm:$0xff]  ;;  %v599_v16 = vld [vmem:[#allocation2 + $0x20] sm:$0xff] }
  0xba   : > { %v600_v17 = vld [vmem:[#allocation2 + $0x30] sm:$0xff]  ;;  %v601_v18 = vld [vmem:[#allocation2 + $0x38] sm:$0xff]  ;;  %v602_v19 = vld [vmem:[#allocation2 + $0x48] sm:$0xff] }
  0xbb   : > { %v603_v20 = vld [vmem:[#allocation2 + $0x50] sm:$0xff]  ;;  %v1710_v33 = vld [vmem:[#allocation8 + $0x100] sm:$0xff] }
  0xbc   : > { %2222 = vmatmul.mubr.msk.f32.gmra.mrb[4].mxu0 %vm269_vm1, %v3100_v38  ;;  %2230 = vmatmul.mubr.msk.f32.gmra.mrb[4].mxu1 %vm269_vm1, %v3100_v38  ;;  %v1712_v35 = vld [vmem:[#allocation8 + $0x110] sm:$0xff]  ;;  %v2297_v44 = vld [vmem:[#allocation2 + $0x3b] sm:$0xff]  ;;  %v2316_v47 = vld [vmem:[#allocation2 + $0x4] sm:$0xff] }
  0xbd   : > { %451 = vmatprep.mubr.f32.mxu0 %v2806_v0  ;;  %564 = vmatprep.mubr.f32.mxu1 %v2806_v0  ;;  %v1716_v36 = vld [vmem:[#allocation8 + $0x130] sm:$0xff]  ;;  %v2318_v49 = vld [vmem:[#allocation2 + $0x1c] sm:$0xff]  ;;  %v2319_v50 = vld [vmem:[#allocation2 + $0x24] sm:$0xff] }
  0xbe   : > { %v2298_v45 = vld [vmem:[#allocation2 + $0x4b] sm:$0xff]  ;;  %v2299_v46 = vld [vmem:[#allocation2 + $0x53] sm:$0xff] }
  0xbf   : > { %v2317_v48 = vld [vmem:[#allocation2 + $0xc] sm:$0xff]  ;;  %v2320_v51 = vld [vmem:[#allocation2 + $0x34] sm:$0xff] }
  0xc0   : > { %2223 = vmatmul.mubr.msk.f32.gmra.mrb[6].mxu0 %vm269_vm1, %v3108_v39  ;;  %2231 = vmatmul.mubr.msk.f32.gmra.mrb[6].mxu1 %vm269_vm1, %v3108_v39 }
  0xc1   : > { %457 = vmatprep.mubr.f32.mxu0 %v2806_v0  ;;  %570 = vmatprep.mubr.f32.mxu1 %v2806_v0 }
  0xc4   : > { %2224 = vmatmul.mubr.msk.f32.gmra.mrb[8].mxu0 %vm269_vm1, %v3116_v40  ;;  %2232 = vmatmul.mubr.msk.f32.gmra.mrb[8].mxu1 %vm269_vm1, %v3116_v40 }
  0xc5   : > { %463 = vmatprep.mubr.f32.mxu0 %v2806_v0  ;;  %576 = vmatprep.mubr.f32.mxu1 %v2806_v0 }
  0xc8   : > { %2225 = vmatmul.mubr.msk.f32.gmra.mrb[10].mxu0 %vm269_vm1, %v3124_v41  ;;  %2233 = vmatmul.mubr.msk.f32.gmra.mrb[10].mxu1 %vm269_vm1, %v3124_v41 }
  0xc9   : > { %469 = vmatprep.mubr.f32.mxu0 %v2806_v0  ;;  %582 = vmatprep.mubr.f32.mxu1 %v2806_v0 }
  0xcc   : > { %2226 = vmatmul.mubr.msk.f32.gmra.mrb[12].mxu0 %vm269_vm1, %v3132_v42  ;;  %2234 = vmatmul.mubr.msk.f32.gmra.mrb[12].mxu1 %vm269_vm1, %v3132_v42 }
  0xcd   : > { %475 = vmatprep.mubr.f32.mxu0 %v2806_v0  ;;  %588 = vmatprep.mubr.f32.mxu1 %v2806_v0 }
  0xd0   : > { %2227 = vmatmul.mubr.msk.f32.gmra.mrb[14].mxu0 %vm269_vm1, %v3140_v43  ;;  %2235 = vmatmul.mubr.msk.f32.gmra.mrb[14].mxu1 %vm269_vm1, %v3140_v43 }
  0xd1   : > { %719 = vmatprep.mubr.f32.mxu0 %v2806_v0  ;;  %832 = vmatprep.mubr.f32.mxu1 %v2806_v0 }
  0xd4   : > { %2244 = vmatmul.mubr.msk.f32.vlgmr.msra.gmra.mrb[16].mxu0 %vm269_vm1, %v2236_v52  ;;  %2252 = vmatmul.mubr.msk.f32.vlgmr.msra.gmra.mrb[16].mxu1 %vm269_vm1, %v2236_v52  ;;  %v2321_v52 = vld [vmem:[#allocation2 + $0x3c] sm:$0xff] }
  0xd5   : > { %2366 = vmatpush1.bf16.msra.mxu0 %v2365_v53  ;;  %2370 = vmatpush1.bf16.msra.mxu1 %v2369_v54  ;;  %v2322_v53 = vld [vmem:[#allocation2 + $0x4c] sm:$0xff]  ;;  %v2323_v54 = vld [vmem:[#allocation2 + $0x54] sm:$0xff] }
  0xd6   : > { %725 = vmatprep.mubr.f32.mxu0 %v2806_v0  ;;  %838 = vmatprep.mubr.f32.mxu1 %v2806_v0 }
  0xd7   : > { %2372 = vmatprep.subr.bf16.mxu0 %v2371_v55  ;;  %2376 = vmatprep.subr.bf16.mxu1 %v2375_v56 }
  0xd8   : > { %2245 = vmatmul.mubr.msk.f32.gmra.mrb[18].mxu0 %vm269_vm1, %v2237_v57  ;;  %2253 = vmatmul.mubr.msk.f32.gmra.mrb[18].mxu1 %vm269_vm1, %v2237_v57 }
  0xd9   : > { %731 = vmatprep.mubr.f32.mxu0 %v2806_v0  ;;  %844 = vmatprep.mubr.f32.mxu1 %v2806_v0 }
  0xdc   : > { %2246 = vmatmul.mubr.msk.f32.gmra.mrb[20].mxu0 %vm269_vm1, %v2238_v58  ;;  %2254 = vmatmul.mubr.msk.f32.gmra.mrb[20].mxu1 %vm269_vm1, %v2238_v58 }
  0xdd   : > { %737 = vmatprep.mubr.f32.mxu0 %v2806_v0  ;;  %850 = vmatprep.mubr.f32.mxu1 %v2806_v0 }
  0xe0   : > { %2247 = vmatmul.mubr.msk.f32.gmra.mrb[22].mxu0 %vm269_vm1, %v2239_v59  ;;  %2255 = vmatmul.mubr.msk.f32.gmra.mrb[22].mxu1 %vm269_vm1, %v2239_v59 }
  0xe1   : > { %743 = vmatprep.mubr.f32.mxu0 %v2806_v0  ;;  %856 = vmatprep.mubr.f32.mxu1 %v2806_v0 }
  0xe4   : > { %2248 = vmatmul.mubr.msk.f32.gmra.mrb[24].mxu0 %vm269_vm1, %v2240_v60  ;;  %2256 = vmatmul.mubr.msk.f32.gmra.mrb[24].mxu1 %vm269_vm1, %v2240_v60 }
  0xe5   : > { %749 = vmatprep.mubr.f32.mxu0 %v2806_v0  ;;  %862 = vmatprep.mubr.f32.mxu1 %v2806_v0 }
  0xe8   : > { %2249 = vmatmul.mubr.msk.f32.gmra.mrb[26].mxu0 %vm269_vm1, %v2241_v61  ;;  %2257 = vmatmul.mubr.msk.f32.gmra.mrb[26].mxu1 %vm269_vm1, %v2241_v61 }
  0xe9   : > { %755 = vmatprep.mubr.f32.mxu0 %v2806_v0  ;;  %868 = vmatprep.mubr.f32.mxu1 %v2806_v0 }
  0xec   : > { %2250 = vmatmul.mubr.msk.f32.gmra.mrb[28].mxu0 %vm269_vm1, %v2242_v62  ;;  %2258 = vmatmul.mubr.msk.f32.gmra.mrb[28].mxu1 %vm269_vm1, %v2242_v62 }
  0xed   : > { %761 = vmatprep.mubr.f32.mxu0 %v2806_v0  ;;  %874 = vmatprep.mubr.f32.mxu1 %v2806_v0 }
  0xf0   : > { %2251 = vmatmul.mubr.msk.f32.gmra.mrb[30].mxu0 %vm269_vm1, %v2243_v63  ;;  %2259 = vmatmul.mubr.msk.f32.gmra.mrb[30].mxu1 %vm269_vm1, %v2243_v63 }
  0xf1   : > { %969 = vmatprep.mubr.f32.mxu0 %v2806_v0  ;;  %1082 = vmatprep.mubr.f32.mxu1 %v2806_v0 }
  0xf4   : > { %2260 = vmatmul.mubr.msk.f32.vlgmr.msra.gmra.mrb[16].mxu0 %vm269_vm1, %v596_v9  ;;  %2268 = vmatmul.mubr.msk.f32.vlgmr.msra.gmra.mrb[16].mxu1 %vm269_vm1, %v596_v9 }
  0xf5   : > { %2374 = vmatpush1.bf16.msra.mxu0 %v2373_v10  ;;  %2378 = vmatpush1.bf16.msra.mxu1 %v2377_v11 }
  0xf6   : > { %975 = vmatprep.mubr.f32.mxu0 %v2806_v0  ;;  %1088 = vmatprep.mubr.f32.mxu1 %v2806_v0 }
  0xf7   : > { %2380 = vmatprep.subr.bf16.mxu0 %v2379_v12  ;;  %2384 = vmatprep.subr.bf16.mxu1 %v2383_v13 }
  0xf8   : > { %2261 = vmatmul.mubr.msk.f32.gmra.mrb[18].mxu0 %vm269_vm1, %v597_v14  ;;  %2269 = vmatmul.mubr.msk.f32.gmra.mrb[18].mxu1 %vm269_vm1, %v597_v14 }
  0xf9   : > { %981 = vmatprep.mubr.f32.mxu0 %v2806_v0  ;;  %1094 = vmatprep.mubr.f32.mxu1 %v2806_v0 }
  0xfc   : > { %2262 = vmatmul.mubr.msk.f32.gmra.mrb[20].mxu0 %vm269_vm1, %v598_v15  ;;  %2270 = vmatmul.mubr.msk.f32.gmra.mrb[20].mxu1 %vm269_vm1, %v598_v15 }
  0xfd   : > { %987 = vmatprep.mubr.f32.mxu0 %v2806_v0  ;;  %1100 = vmatprep.mubr.f32.mxu1 %v2806_v0 }
 0x100   : > { %2263 = vmatmul.mubr.msk.f32.gmra.mrb[22].mxu0 %vm269_vm1, %v599_v16  ;;  %2271 = vmatmul.mubr.msk.f32.gmra.mrb[22].mxu1 %vm269_vm1, %v599_v16 }
 0x101   : > { %993 = vmatprep.mubr.f32.mxu0 %v2806_v0  ;;  %1106 = vmatprep.mubr.f32.mxu1 %v2806_v0 }
 0x104   : > { %2264 = vmatmul.mubr.msk.f32.gmra.mrb[24].mxu0 %vm269_vm1, %v600_v17  ;;  %2272 = vmatmul.mubr.msk.f32.gmra.mrb[24].mxu1 %vm269_vm1, %v600_v17 }
 0x105   : > { %999 = vmatprep.mubr.f32.mxu0 %v2806_v0  ;;  %1112 = vmatprep.mubr.f32.mxu1 %v2806_v0 }
 0x108   : > { %2265 = vmatmul.mubr.msk.f32.gmra.mrb[26].mxu0 %vm269_vm1, %v601_v18  ;;  %2273 = vmatmul.mubr.msk.f32.gmra.mrb[26].mxu1 %vm269_vm1, %v601_v18 }
 0x109   : > { %1005 = vmatprep.mubr.f32.mxu0 %v2806_v0  ;;  %1118 = vmatprep.mubr.f32.mxu1 %v2806_v0 }
 0x10c   : > { %2266 = vmatmul.mubr.msk.f32.gmra.mrb[28].mxu0 %vm269_vm1, %v602_v19  ;;  %2274 = vmatmul.mubr.msk.f32.gmra.mrb[28].mxu1 %vm269_vm1, %v602_v19 }
 0x10d   : > { %1011 = vmatprep.mubr.f32.mxu0 %v2806_v0  ;;  %1124 = vmatprep.mubr.f32.mxu1 %v2806_v0 }
 0x110   : > { %2267 = vmatmul.mubr.msk.f32.gmra.mrb[30].mxu0 %vm269_vm1, %v603_v20  ;;  %2275 = vmatmul.mubr.msk.f32.gmra.mrb[30].mxu1 %vm269_vm1, %v603_v20 }
 0x111   : > { %1204 = vmatprep.mubr.f32.mxu0 %v2806_v0  ;;  %1317 = vmatprep.mubr.f32.mxu1 %v2806_v0 }
 0x114   : > { %2276 = vmatmul.mubr.msk.f32.vlgmr.msra.gmra.mrb[16].mxu0 %vm269_vm1, %v3084_v34  ;;  %2284 = vmatmul.mubr.msk.f32.vlgmr.msra.gmra.mrb[16].mxu1 %vm269_vm1, %v3084_v34  ;;  %v1714_v34 = vld [vmem:[#allocation8 + $0x120] sm:$0xff] }
 0x115   : > { %2382 = vmatpush1.bf16.msra.mxu0 %v2381_v26  ;;  %2386 = vmatpush1.bf16.msra.mxu1 %v2385_v30 }
 0x116   : > { %1210 = vmatprep.mubr.f32.mxu0 %v2806_v0  ;;  %1323 = vmatprep.mubr.f32.mxu1 %v2806_v0 }
 0x117   : > { %2388 = vmatprep.subr.bf16.mxu0 %v2387_v31  ;;  %2392 = vmatprep.subr.bf16.mxu1 %v2391_v32 }
 0x118   : > { %2277 = vmatmul.mubr.msk.f32.gmra.mrb[18].mxu0 %vm269_vm1, %v3092_v37  ;;  %2285 = vmatmul.mubr.msk.f32.gmra.mrb[18].mxu1 %vm269_vm1, %v3092_v37  ;;  %v2292_v37 = vld [vmem:[#allocation2 + $0x3] sm:$0xff] }
 0x119   : > { %1216 = vmatprep.mubr.f32.mxu0 %v2806_v0  ;;  %1329 = vmatprep.mubr.f32.mxu1 %v2806_v0 }
 0x11c   : > { %2278 = vmatmul.mubr.msk.f32.gmra.mrb[20].mxu0 %vm269_vm1, %v3100_v38  ;;  %2286 = vmatmul.mubr.msk.f32.gmra.mrb[20].mxu1 %vm269_vm1, %v3100_v38  ;;  %v2389_v38 = vpack.c.bf16 %v1714_v34, %v1710_v33 }
 0x11d   : > { %1222 = vmatprep.mubr.f32.mxu0 %v2806_v0  ;;  %1335 = vmatprep.mubr.f32.mxu1 %v2806_v0 }
 0x120   : > { %2279 = vmatmul.mubr.msk.f32.gmra.mrb[22].mxu0 %vm269_vm1, %v3108_v39  ;;  %2287 = vmatmul.mubr.msk.f32.gmra.mrb[22].mxu1 %vm269_vm1, %v3108_v39  ;;  %v2393_v39 = vpack.c.bf16 %v1716_v36, %v1712_v35 }
 0x121   : > { %1228 = vmatprep.mubr.f32.mxu0 %v2806_v0  ;;  %1341 = vmatprep.mubr.f32.mxu1 %v2806_v0 }
 0x124   : > { %2280 = vmatmul.mubr.msk.f32.gmra.mrb[24].mxu0 %vm269_vm1, %v3116_v40  ;;  %2288 = vmatmul.mubr.msk.f32.gmra.mrb[24].mxu1 %vm269_vm1, %v3116_v40  ;;  %v2293_v40 = vld [vmem:[#allocation2 + $0xb] sm:$0xff] }
 0x125   : > { %1234 = vmatprep.mubr.f32.mxu0 %v2806_v0  ;;  %1347 = vmatprep.mubr.f32.mxu1 %v2806_v0 }
 0x128   : > { %2281 = vmatmul.mubr.msk.f32.gmra.mrb[26].mxu0 %vm269_vm1, %v3124_v41  ;;  %2289 = vmatmul.mubr.msk.f32.gmra.mrb[26].mxu1 %vm269_vm1, %v3124_v41  ;;  %v2294_v41 = vld [vmem:[#allocation2 + $0x1b] sm:$0xff] }
 0x129   : > { %1240 = vmatprep.mubr.f32.mxu0 %v2806_v0  ;;  %1353 = vmatprep.mubr.f32.mxu1 %v2806_v0 }
 0x12c   : > { %2282 = vmatmul.mubr.msk.f32.gmra.mrb[28].mxu0 %vm269_vm1, %v3132_v42  ;;  %2290 = vmatmul.mubr.msk.f32.gmra.mrb[28].mxu1 %vm269_vm1, %v3132_v42  ;;  %v2295_v42 = vld [vmem:[#allocation2 + $0x23] sm:$0xff] }
 0x12d   : > { %1246 = vmatprep.mubr.f32.mxu0 %v2806_v0  ;;  %1359 = vmatprep.mubr.f32.mxu1 %v2806_v0 }
 0x130   : > { %2283 = vmatmul.mubr.msk.f32.gmra.mrb[30].mxu0 %vm269_vm1, %v3140_v43  ;;  %2291 = vmatmul.mubr.msk.f32.gmra.mrb[30].mxu1 %vm269_vm1, %v3140_v43  ;;  %v2296_v43 = vld [vmem:[#allocation2 + $0x33] sm:$0xff] }
 0x131   : > { %1505 = vmatprep.mubr.f32.mxu0 %v2806_v0  ;;  %1618 = vmatprep.mubr.f32.mxu1 %v2806_v0 }
 0x134   : > { %2300 = vmatmul.mubr.msk.f32.vlgmr.msra.gmra.mrb[16].mxu0 %vm269_vm1, %v2292_v37  ;;  %2308 = vmatmul.mubr.msk.f32.vlgmr.msra.gmra.mrb[16].mxu1 %vm269_vm1, %v2292_v37 }
 0x135   : > { %2390 = vmatpush1.bf16.msra.mxu0 %v2389_v38  ;;  %2394 = vmatpush1.bf16.msra.mxu1 %v2393_v39 }
 0x136   : > { %1511 = vmatprep.mubr.f32.mxu0 %v2806_v0  ;;  %1624 = vmatprep.mubr.f32.mxu1 %v2806_v0 }
 0x138   : > { %2301 = vmatmul.mubr.msk.f32.gmra.mrb[18].mxu0 %vm269_vm1, %v2293_v40  ;;  %2309 = vmatmul.mubr.msk.f32.gmra.mrb[18].mxu1 %vm269_vm1, %v2293_v40 }
 0x139   : > { %1517 = vmatprep.mubr.f32.mxu0 %v2806_v0  ;;  %1630 = vmatprep.mubr.f32.mxu1 %v2806_v0 }
 0x13c   : > { %2302 = vmatmul.mubr.msk.f32.gmra.mrb[20].mxu0 %vm269_vm1, %v2294_v41  ;;  %2310 = vmatmul.mubr.msk.f32.gmra.mrb[20].mxu1 %vm269_vm1, %v2294_v41 }
 0x13d   : > { %1523 = vmatprep.mubr.f32.mxu0 %v2806_v0  ;;  %1636 = vmatprep.mubr.f32.mxu1 %v2806_v0 }
 0x140   : > { %2303 = vmatmul.mubr.msk.f32.gmra.mrb[22].mxu0 %vm269_vm1, %v2295_v42  ;;  %2311 = vmatmul.mubr.msk.f32.gmra.mrb[22].mxu1 %vm269_vm1, %v2295_v42 }
 0x141   : > { %1529 = vmatprep.mubr.f32.mxu0 %v2806_v0  ;;  %1642 = vmatprep.mubr.f32.mxu1 %v2806_v0 }
 0x144   : > { %2304 = vmatmul.mubr.msk.f32.gmra.mrb[24].mxu0 %vm269_vm1, %v2296_v43  ;;  %2312 = vmatmul.mubr.msk.f32.gmra.mrb[24].mxu1 %vm269_vm1, %v2296_v43 }
 0x145   : > { %1535 = vmatprep.mubr.f32.mxu0 %v2806_v0  ;;  %1648 = vmatprep.mubr.f32.mxu1 %v2806_v0 }
 0x148   : > { %2305 = vmatmul.mubr.msk.f32.gmra.mrb[26].mxu0 %vm269_vm1, %v2297_v44  ;;  %2313 = vmatmul.mubr.msk.f32.gmra.mrb[26].mxu1 %vm269_vm1, %v2297_v44 }
 0x149   : > { %1541 = vmatprep.mubr.f32.mxu0 %v2806_v0  ;;  %1654 = vmatprep.mubr.f32.mxu1 %v2806_v0 }
 0x14c   : > { %2306 = vmatmul.mubr.msk.f32.gmra.mrb[28].mxu0 %vm269_vm1, %v2298_v45  ;;  %2314 = vmatmul.mubr.msk.f32.gmra.mrb[28].mxu1 %vm269_vm1, %v2298_v45 }
 0x14d   : > { %1547 = vmatprep.mubr.f32.mxu0 %v2806_v0  ;;  %1660 = vmatprep.mubr.f32.mxu1 %v2806_v0 }
 0x150   : > { %2307 = vmatmul.mubr.msk.f32.gmra.mrb[30].mxu0 %vm269_vm1, %v2299_v46  ;;  %2315 = vmatmul.mubr.msk.f32.gmra.mrb[30].mxu1 %vm269_vm1, %v2299_v46 }
 0x151   : > { %1806 = vmatprep.mubr.f32.mxu0 %v2806_v0  ;;  %1919 = vmatprep.mubr.f32.mxu1 %v2806_v0 }
 0x154   : > { %2324 = vmatmul.mubr.msk.f32.vlgmr.msra.gmra.mrb[16].mxu0 %vm269_vm1, %v2316_v47  ;;  %2332 = vmatmul.mubr.msk.f32.vlgmr.msra.gmra.mrb[16].mxu1 %vm269_vm1, %v2316_v47 }
 0x155   : > { %1812 = vmatprep.mubr.f32.mxu0 %v2806_v0  ;;  %1925 = vmatprep.mubr.f32.mxu1 %v2806_v0 }
 0x158   : > { %2325 = vmatmul.mubr.msk.f32.gmra.mrb[18].mxu0 %vm269_vm1, %v2317_v48  ;;  %2333 = vmatmul.mubr.msk.f32.gmra.mrb[18].mxu1 %vm269_vm1, %v2317_v48 }
 0x159   : > { %1818 = vmatprep.mubr.f32.mxu0 %v2806_v0  ;;  %1931 = vmatprep.mubr.f32.mxu1 %v2806_v0 }
 0x15c   : > { %2326 = vmatmul.mubr.msk.f32.gmra.mrb[20].mxu0 %vm269_vm1, %v2318_v49  ;;  %2334 = vmatmul.mubr.msk.f32.gmra.mrb[20].mxu1 %vm269_vm1, %v2318_v49 }
 0x15d   : > { %1824 = vmatprep.mubr.f32.mxu0 %v2806_v0  ;;  %1937 = vmatprep.mubr.f32.mxu1 %v2806_v0 }
 0x160   : > { %2327 = vmatmul.mubr.msk.f32.gmra.mrb[22].mxu0 %vm269_vm1, %v2319_v50  ;;  %2335 = vmatmul.mubr.msk.f32.gmra.mrb[22].mxu1 %vm269_vm1, %v2319_v50 }
 0x161   : > { %1830 = vmatprep.mubr.f32.mxu0 %v2806_v0  ;;  %1943 = vmatprep.mubr.f32.mxu1 %v2806_v0 }
 0x164   : > { %2328 = vmatmul.mubr.msk.f32.gmra.mrb[24].mxu0 %vm269_vm1, %v2320_v51  ;;  %2336 = vmatmul.mubr.msk.f32.gmra.mrb[24].mxu1 %vm269_vm1, %v2320_v51 }
 0x165   : > { %1836 = vmatprep.mubr.f32.mxu0 %v2806_v0  ;;  %1949 = vmatprep.mubr.f32.mxu1 %v2806_v0 }
 0x168   : > { %2329 = vmatmul.mubr.msk.f32.gmra.mrb[26].mxu0 %vm269_vm1, %v2321_v52  ;;  %2337 = vmatmul.mubr.msk.f32.gmra.mrb[26].mxu1 %vm269_vm1, %v2321_v52 }
 0x169   : > { %1842 = vmatprep.mubr.f32.mxu0 %v2806_v0  ;;  %1955 = vmatprep.mubr.f32.mxu1 %v2806_v0 }
 0x16c   : > { %2330 = vmatmul.mubr.msk.f32.gmra.mrb[28].mxu0 %vm269_vm1, %v2322_v53  ;;  %2338 = vmatmul.mubr.msk.f32.gmra.mrb[28].mxu1 %vm269_vm1, %v2322_v53 }
 0x16d   : > { %1848 = vmatprep.mubr.f32.mxu0 %v2806_v0  ;;  %1961 = vmatprep.mubr.f32.mxu1 %v2806_v0 }
 0x170   : > { %2331 = vmatmul.mubr.msk.f32.gmra.mrb[30].mxu0 %vm269_vm1, %v2323_v54  ;;  %2339 = vmatmul.mubr.msk.f32.gmra.mrb[30].mxu1 %vm269_vm1, %v2323_v54 }
 0x187   : > { %v435_v55 = vpop.f32.mrb[0].mxu0  ;;  %v548_v56 = vpop.f32.mrb[0].mxu1 }
 0x188   : > { %v437_v57 = vpop.f32.mrb[1].mxu0  ;;  %v550_v58 = vpop.f32.mrb[1].mxu1 }
 0x18b   : > { %v441_v59 = vpop.f32.mrb[2].mxu0  ;;  %v554_v60 = vpop.f32.mrb[2].mxu1 }
 0x18c   : > { %v443_v61 = vpop.f32.mrb[3].mxu0  ;;  %v556_v62 = vpop.f32.mrb[3].mxu1 }
 0x18f   : > { %v447_v63 = vpop.f32.mrb[4].mxu0  ;;  %v560_v1 = vpop.f32.mrb[4].mxu1 }
 0x190   : > { %v449_v2 = vpop.f32.mrb[5].mxu0  ;;  %v562_v3 = vpop.f32.mrb[5].mxu1 }
 0x193   : > { %v453_v4 = vpop.f32.mrb[6].mxu0  ;;  %v566_v5 = vpop.f32.mrb[6].mxu1 }
 0x194   : > { %v455_v0 = vpop.f32.mrb[7].mxu0  ;;  %v568_v6 = vpop.f32.mrb[7].mxu1 }
 0x197   : > { %v3322_v7 = vpop.f32.mrb[8].mxu0  ;;  %v3324_v8 = vpop.f32.mrb[8].mxu1 }
 0x198   : > { %v3326_v9 = vpop.f32.mrb[9].mxu0  ;;  %v3328_v10 = vpop.f32.mrb[9].mxu1 }
 0x19b   : > { %v3330_v11 = vpop.f32.mrb[10].mxu0  ;;  %v3332_v12 = vpop.f32.mrb[10].mxu1 }
 0x19c   : > { %v3334_v13 = vpop.f32.mrb[11].mxu0  ;;  %v3336_v14 = vpop.f32.mrb[11].mxu1 }
 0x19f   : > { %v3338_v15 = vpop.f32.mrb[12].mxu0  ;;  %v3340_v16 = vpop.f32.mrb[12].mxu1 }
 0x1a0   : > { %v3342_v17 = vpop.f32.mrb[13].mxu0  ;;  %v3344_v18 = vpop.f32.mrb[13].mxu1 }
 0x1a3   : > { %v3346_v19 = vpop.f32.mrb[14].mxu0  ;;  %v3348_v20 = vpop.f32.mrb[14].mxu1 }
 0x1a4   : > { %v3350_v21 = vpop.f32.mrb[15].mxu0  ;;  %v3352_v22 = vpop.f32.mrb[15].mxu1 }
 0x227   : > { %v1808_v27 = vpop.f32.mrb[16].mxu0  ;;  %v1921_v28 = vpop.f32.mrb[16].mxu1 }
 0x228   : > { %v2000_v23 = vmul.f32 %v1808_v27, %v435_v55  ;;  %v2002_v29 = vmul.f32 %v1921_v28, %v548_v56  ;;  %v1810_v24 = vpop.f32.mrb[17].mxu0  ;;  %v1923_v25 = vpop.f32.mrb[17].mxu1 }
 0x229   : > { %v2001_v26 = vmul.f32 %v1810_v24, %v437_v57  ;;  %v2003_v30 = vmul.f32 %v1923_v25, %v550_v58 }
 0x22a   : > { %2032 = vst [vmem:[%s3355_s22] sm:$0xff] %v2000_v23  ;;  %2034 = vst [vmem:[%s3355_s22 + $0x10] sm:$0xff] %v2002_v29 }
 0x22b   : > { %2033 = vst [vmem:[%s3355_s22 + $0x8] sm:$0xff] %v2001_v26  ;;  %2035 = vst.msk [vmem:[%s3355_s22 + $0x18] sm:$0xff] %vm269_vm1, %v2003_v30  ;;  %v1814_v31 = vpop.f32.mrb[18].mxu0  ;;  %v1927_v32 = vpop.f32.mrb[18].mxu1 }
 0x22c   : > { %v2004_v33 = vmul.f32 %v1814_v31, %v441_v59  ;;  %v2006_v34 = vmul.f32 %v1927_v32, %v554_v60  ;;  %v1816_v35 = vpop.f32.mrb[19].mxu0  ;;  %v1929_v36 = vpop.f32.mrb[19].mxu1 }
 0x22d   : > { %v2005_v37 = vmul.f32 %v1816_v35, %v443_v61  ;;  %v2007_v38 = vmul.f32 %v1929_v36, %v556_v62 }
 0x22e   : > { %2036 = vst [vmem:[%s3355_s22 + $0x20] sm:$0xff] %v2004_v33  ;;  %2038 = vst [vmem:[%s3355_s22 + $0x30] sm:$0xff] %v2006_v34 }
 0x22f   : > { %2037 = vst [vmem:[%s3355_s22 + $0x28] sm:$0xff] %v2005_v37  ;;  %2039 = vst.msk [vmem:[%s3355_s22 + $0x38] sm:$0xff] %vm269_vm1, %v2007_v38  ;;  %v1820_v39 = vpop.f32.mrb[20].mxu0  ;;  %v1933_v40 = vpop.f32.mrb[20].mxu1 }
 0x230   : > { %v2008_v41 = vmul.f32 %v1820_v39, %v447_v63  ;;  %v2010_v42 = vmul.f32 %v1933_v40, %v560_v1  ;;  %v1822_v43 = vpop.f32.mrb[21].mxu0  ;;  %v1935_v44 = vpop.f32.mrb[21].mxu1 }
 0x231   : > { %v2009_v45 = vmul.f32 %v1822_v43, %v449_v2  ;;  %v2011_v46 = vmul.f32 %v1935_v44, %v562_v3 }
 0x232   : > { %2040 = vst [vmem:[%s3355_s22 + $0x40] sm:$0xff] %v2008_v41  ;;  %2042 = vst [vmem:[%s3355_s22 + $0x50] sm:$0xff] %v2010_v42 }
 0x233   : > { %2041 = vst [vmem:[%s3355_s22 + $0x48] sm:$0xff] %v2009_v45  ;;  %2043 = vst.msk [vmem:[%s3355_s22 + $0x58] sm:$0xff] %vm269_vm1, %v2011_v46  ;;  %v1826_v47 = vpop.f32.mrb[22].mxu0  ;;  %v1939_v48 = vpop.f32.mrb[22].mxu1 }
 0x234   : > { %v2012_v49 = vmul.f32 %v1826_v47, %v453_v4  ;;  %v2014_v50 = vmul.f32 %v1939_v48, %v566_v5  ;;  %v1828_v51 = vpop.f32.mrb[23].mxu0  ;;  %v1941_v52 = vpop.f32.mrb[23].mxu1 }
 0x235   : > { %v2013_v53 = vmul.f32 %v1828_v51, %v455_v0  ;;  %v2015_v54 = vmul.f32 %v1941_v52, %v568_v6 }
 0x236   : > { %2044 = vst [vmem:[%s3355_s22 + $0x60] sm:$0xff] %v2012_v49  ;;  %2046 = vst [vmem:[%s3355_s22 + $0x70] sm:$0xff] %v2014_v50 }
 0x237   : > { %2045 = vst [vmem:[%s3355_s22 + $0x68] sm:$0xff] %v2013_v53  ;;  %2047 = vst.msk [vmem:[%s3355_s22 + $0x78] sm:$0xff] %vm269_vm1, %v2015_v54  ;;  %v1832_v55 = vpop.f32.mrb[24].mxu0  ;;  %v1945_v56 = vpop.f32.mrb[24].mxu1 }
 0x238   : > { %v2016_v57 = vmul.f32 %v1832_v55, %v3322_v7  ;;  %v2018_v58 = vmul.f32 %v1945_v56, %v3324_v8  ;;  %v1834_v59 = vpop.f32.mrb[25].mxu0  ;;  %v1947_v60 = vpop.f32.mrb[25].mxu1 }
 0x239   : > { %v2017_v61 = vmul.f32 %v1834_v59, %v3326_v9  ;;  %v2019_v62 = vmul.f32 %v1947_v60, %v3328_v10 }
 0x23a   : > { %2048 = vst [vmem:[%s3355_s22 + $0x80] sm:$0xff] %v2016_v57  ;;  %2050 = vst [vmem:[%s3355_s22 + $0x90] sm:$0xff] %v2018_v58 }
 0x23b   : > { %2049 = vst [vmem:[%s3355_s22 + $0x88] sm:$0xff] %v2017_v61  ;;  %2051 = vst.msk [vmem:[%s3355_s22 + $0x98] sm:$0xff] %vm269_vm1, %v2019_v62  ;;  %v1838_v63 = vpop.f32.mrb[26].mxu0  ;;  %v1951_v1 = vpop.f32.mrb[26].mxu1 }
 0x23c   : > { %v2020_v2 = vmul.f32 %v1838_v63, %v3330_v11  ;;  %v2022_v3 = vmul.f32 %v1951_v1, %v3332_v12  ;;  %v1840_v4 = vpop.f32.mrb[27].mxu0  ;;  %v1953_v5 = vpop.f32.mrb[27].mxu1 }
 0x23d   : > { %v2021_v0 = vmul.f32 %v1840_v4, %v3334_v13  ;;  %v2023_v6 = vmul.f32 %v1953_v5, %v3336_v14 }
 0x23e   : > { %2052 = vst [vmem:[%s3355_s22 + $0xa0] sm:$0xff] %v2020_v2  ;;  %2054 = vst [vmem:[%s3355_s22 + $0xb0] sm:$0xff] %v2022_v3 }
 0x23f   : > { %2053 = vst [vmem:[%s3355_s22 + $0xa8] sm:$0xff] %v2021_v0  ;;  %2055 = vst.msk [vmem:[%s3355_s22 + $0xb8] sm:$0xff] %vm269_vm1, %v2023_v6  ;;  %v1844_v7 = vpop.f32.mrb[28].mxu0  ;;  %v1957_v8 = vpop.f32.mrb[28].mxu1 }
 0x240   : > { %v2024_v9 = vmul.f32 %v1844_v7, %v3338_v15  ;;  %v2026_v10 = vmul.f32 %v1957_v8, %v3340_v16  ;;  %v1846_v11 = vpop.f32.mrb[29].mxu0  ;;  %v1959_v12 = vpop.f32.mrb[29].mxu1 }
 0x241   : > { %v2025_v13 = vmul.f32 %v1846_v11, %v3342_v17  ;;  %v2027_v14 = vmul.f32 %v1959_v12, %v3344_v18 }
 0x242   : > { %2056 = vst [vmem:[%s3355_s22 + $0xc0] sm:$0xff] %v2024_v9  ;;  %2058 = vst [vmem:[%s3355_s22 + $0xd0] sm:$0xff] %v2026_v10 }
 0x243   : > { %2057 = vst [vmem:[%s3355_s22 + $0xc8] sm:$0xff] %v2025_v13  ;;  %2059 = vst.msk [vmem:[%s3355_s22 + $0xd8] sm:$0xff] %vm269_vm1, %v2027_v14  ;;  %v1850_v15 = vpop.f32.mrb[30].mxu0  ;;  %v1963_v16 = vpop.f32.mrb[30].mxu1 }
 0x244   : > { %v2028_v27 = vmul.f32 %v1850_v15, %v3346_v19  ;;  %v2030_v17 = vmul.f32 %v1963_v16, %v3348_v20  ;;  %v1852_v18 = vpop.f32.mrb[31].mxu0  ;;  %v1965_v28 = vpop.f32.mrb[31].mxu1 }
 0x245   : > { %v2029_v23 = vmul.f32 %v1852_v18, %v3350_v21  ;;  %v2031_v29 = vmul.f32 %v1965_v28, %v3352_v22 }
 0x246   : > { %2060 = vst [vmem:[%s3355_s22 + $0xe0] sm:$0xff] %v2028_v27  ;;  %2062 = vst [vmem:[%s3355_s22 + $0xf0] sm:$0xff] %v2030_v17 }
 0x247   : > { %2061 = vst [vmem:[%s3355_s22 + $0xe8] sm:$0xff] %v2029_v23  ;;  %2063 = vst.msk [vmem:[%s3355_s22 + $0xf8] sm:$0xff] %vm269_vm1, %v2031_v29 }
 0x248   : > { %2724 = shalt.err (!%p2721_p11)
}
 0x249   : > { %s2725_s9 = scalar_lea.hbm %s3411_s8, 4096  ;;  %s2729_s29 = scalar_lea.hbm %s3472_s3, 8192 }
 0x24a   : > { %p2726_p0 = scmp.ne.s32.totalorder %s3411_s8, %s2725_s9  ;;  %p2730_p6 = scmp.lt.u32.totalorder %s3411_s8, %s3472_s3 }
 0x24b   : > { %p2731_p7 = scmp.lt.u32.totalorder %s2729_s29, %s2725_s9  ;;  %p2733_p8 = scmp.lt.u32.totalorder %s2725_s9, %s3411_s8 }
 0x24c   : > { %p2727_p4 = pnand %p2726_p0, %p3487_p12 }
 0x24d   : > { %p2732_p2 = por %p2731_p7, %p2730_p6 }
 0x24e   : > { %p2728_p13 = pneg %p2727_p4 }
 0x24f   : > { %p2734_p1 = por %p2733_p8, %p2732_p2 }
 0x251   : > { %p2735_p10 = pnand %p2734_p1, %p2728_p13 }
 0x253   : > { %2738 = shalt.err (!%p2735_p10)
}
 0x254   : > { %s2808_s22 = smov 512   ;;  %s2809_s24 = smov 32  }
 0x255   : > { %2533 = dma.vmem_to_hbm [thread:$0]  (%p3487_p12), %s3413_s6, 4096, %s3411_s8, %s2065_s26, %s2808_s22, %s2808_s22, %s2809_s24  }
 0x256 PF: > { %s2096_s15 = sand.u32 1, %s2777_s12   ;;  %p3488_p3 = scmp.ne.s32.totalorder %s3480_s23, 0 }
 0x257   : > { %p3489_p5 = scmp.ge.s32.totalorder %s2797_s17, 2  ;;  %s2097_s7 = scalar_lea.sflag [#allocation5], %s2096_s15 }
 0x259   : > { %p2547_p9 = pnand %p3489_p5, %p3488_p3 }
 0x25b   : > { %2772 = dma.done.wait (!%p2547_p9), %s2097_s7, 4096  }
 0x25c   : > { %2774 = vsyncadd (!%p2547_p9), %s2097_s7, 4294963200  ;;  %s20_s17 = sadd.s32 1, %s2797_s17   ;;  %s3490_s12 = smov %s2781_s13 }
 0x25d   : > { %p17_p11 = scmp.ge.s32.totalorder %s20_s17, 4   ;;  %s3491_s13 = smov %s2785_s14 }
 0x25e   : > { %s3492_s14 = smov %s2972_s18  ;;  %s3493_s15 = smov %s2793_s16 }
 0x25f   : > { %s3494_s16 = smov %s3496_s19  ;;  %19 = sbr.rel (!%p17_p11) target bundleno = 7 (0x7), region = 98 }
 0x266   :  { %2102 = vsyncpa [#allocation4], 1 }
 0x267   :  { %2104 = vsyncpa [#allocation4 + $0x1], 1 }
 0x268   :  { %2105 = vsyncpa [#allocation7], 1 }
 0x269   :  { %2106 = vsyncpa [#allocation5], 1 }
 0x26a   :  { %2108 = vsyncpa [#allocation5 + $0x1], 1 }

</bundles_post_ra>
